<compile_context>
chip_gen: v5e
topology: v5e:2x2
jax: 0.10.0
libtpu: 0.0.40
codegen_flags: <defaults>
</compile_context>

<pallas_src>
import jax
import jax.numpy as jnp
from jax.experimental import pallas as pl
from jax.experimental.pallas import tpu as pltpu

_MIB = 1024 * 1024


def _cdiv(a, b):
    return -(-a // b)


def _round_up(x, m):
    return _cdiv(x, m) * m


def _vmem_config():
    """Generation-aware (budget, vmem_limit_bytes, num_tensorcores, mxu_depth)."""
    capacity = 128 * _MIB      # v5e/v6e per-core VMEM
    num_cores = 1
    mxu_depth = 256
    try:
        info = pltpu.get_tpu_info()
        cap = getattr(info, "vmem_capacity_bytes", None)
        if cap:
            capacity = int(cap)
        for attr in ("num_tensorcores", "tensorcore_count", "num_cores"):
            val = getattr(info, attr, None)
            if val:
                num_cores = int(val)
                break
    except Exception:
        pass
    try:
        kind = jax.devices()[0].device_kind.lower()
    except Exception:
        kind = ""
    if "v7" in kind:
        capacity = min(capacity, 64 * _MIB)   # 64 MiB per TC on v7x
        num_cores = max(num_cores, 2)         # 2 TensorCores per chip
    elif "v4" in kind or "v5p" in kind:
        num_cores = max(num_cores, 2)         # megacore
    if "v5e" in kind or "v5 lite" in kind or "v5lite" in kind:
        mxu_depth = 128                       # 4x128^2 MXU on v5e
    budget = capacity // 2
    limit = min((capacity * 3) // 4, capacity - 8 * _MIB)
    return budget, limit, num_cores, mxu_depth


# ----------------------------- kernels --------------------------------------


def _mf_kernel_fullk(p_ref, r_ref, o_ref):
    """Full-K contraction for one output tile: o = p @ r (single MXU shot)."""
    o_ref[...] = jnp.dot(
        p_ref[...], r_ref[...], preferred_element_type=jnp.float32
    ).astype(o_ref.dtype)


def _mf_kernel_ktiled(p_ref, r_ref, o_ref, acc_ref):
    """Fallback for huge n_factors: f32 scratch accumulator over the K axis,
    single cast/store on the last K step."""
    @pl.when(pl.program_id(2) == 0)
    def _():
        acc_ref[...] = jnp.zeros_like(acc_ref)

    acc_ref[...] += jnp.dot(
        p_ref[...], r_ref[...], preferred_element_type=jnp.float32
    )

    @pl.when(pl.program_id(2) == pl.num_programs(2) - 1)
    def _():
        o_ref[...] = acc_ref[...].astype(o_ref.dtype)


# --------------------------- tile planning ----------------------------------


def _choose_plan(M, N, K, in_item, out_item, budget, num_cores, mxu_depth):
    """Returns (mode, tm, tn, tk). Preference order:
       1) full-K contraction with full-N resident (pinned) RHS
       2) full-K contraction with N tiled in 128-lane multiples
       3) K-tiled accumulation (very large n_factors only)."""
    M_eff = _round_up(M, 8)
    Np = _round_up(N, 128)

    tm_cands = sorted({min(c, M_eff) for c in (1024, 512, 256, 128, 64, 32, 16, 8)},
                      reverse=True)
    tn_cands = sorted({min(c, Np) for c in (8192, 4096, 2048, 1024, 512, 256, 128)},
                      reverse=True)

    def tile_bytes(rows, cols, item):
        # Layout-padded footprint: 8 sublanes x 128 lanes granularity.
        return _round_up(rows, 8) * _round_up(cols, 128) * item

    def core_split(tm, n_col_blocks):
        # v7x (2 TCs): keep >= 2 blocks per TensorCore on the parallel axes so
        # each core still software-pipelines. Skip entirely on 1-core chips.
        if num_cores <= 1:
            return tm
        min_blocks = 2 * num_cores
        while _cdiv(M_eff, tm) * n_col_blocks < min_blocks and tm > 8:
            new_tm = max(8, _round_up(tm // 2, 8))
            if new_tm == tm:
                break
            tm = new_tm
        return tm

    # --- Path 1: full-K, full-N (pinned RHS). Conservative accounting:
    #     LHS & OUT counted triple-buffered (Buffered(3) hint requested),
    #     RHS counted double-buffered even though Buffered(1) is requested.
    for tm in tm_cands:
        foot = (3 * tile_bytes(tm, K, in_item)
                + 2 * tile_bytes(K, Np, in_item)
                + 3 * tile_bytes(tm, Np, out_item))
        if foot <= budget:
            return "fullk_fulln", core_split(tm, 1), Np, K

    # --- Path 2: full-K, tiled N (tn multiple of 128).
    for tn in tn_cands:
        if tn >= Np:
            continue
        for tm in tm_cands:
            foot = 2 * (tile_bytes(tm, K, in_item)
                        + tile_bytes(K, tn, in_item)
                        + tile_bytes(tm, tn, out_item))
            if foot <= budget:
                return "fullk", core_split(tm, _cdiv(Np, tn)), tn, K

    # --- Path 3: K-tiled accumulation.
    Kp128 = _round_up(K, 128)
    base = sorted({min(c, Kp128) for c in (2048, 1024, 512, 384, 256, 128)},
                  reverse=True)
    if mxu_depth == 256:
        tk_cands = [c for c in base if c % 256 == 0] + [c for c in base if c % 256]
    else:
        tk_cands = base
    for tk in tk_cands:
        for tn in tn_cands:
            for tm in tm_cands:
                foot = (2 * (tile_bytes(tm, tk, in_item)
                             + tile_bytes(tk, tn, in_item)
                             + tile_bytes(tm, tn, out_item))
                        + tile_bytes(tm, tn, 4))            # f32 accumulator
                if foot <= budget:
                    return "ktiled", core_split(tm, _cdiv(Np, tn)), tn, tk
    raise ValueError(
        f"could not find a VMEM-friendly tiling for M={M}, N={N}, K={K}, "
        f"budget={budget} bytes")


# ------------------------------ wrapper --------------------------------------


def matrix_factorization_forward(peptide_factors, run_factors, *,
                                 vmem_tile_budget=None, factor_dtype=None):
    """Reconstruct the (n_peptides, n_runs) matrix with a Pallas TPU matmul.

    peptide_factors : (n_peptides, n_factors)
    run_factors     : (n_factors, n_runs)
    factor_dtype    : optional compute dtype for the factors (e.g. jnp.bfloat16)
                      to halve HBM traffic; accumulation stays f32.
    """
    M, K = peptide_factors.shape
    K2, N = run_factors.shape
    if K != K2:
        raise ValueError("inner dimensions must match")
    out_dtype = peptide_factors.dtype

    budget, vmem_limit, num_cores, mxu_depth = _vmem_config()
    if vmem_tile_budget is not None:
        budget = int(vmem_tile_budget)

    lhs, rhs = peptide_factors, run_factors
    if factor_dtype is not None:
        lhs = lhs.astype(factor_dtype)
        rhs = rhs.astype(factor_dtype)

    in_item = jnp.dtype(lhs.dtype).itemsize
    out_item = jnp.dtype(out_dtype).itemsize

    mode, tm, tn, tk = _choose_plan(M, N, K, in_item, out_item, budget,
                                    num_cores, mxu_depth)

    grid_m = _cdiv(M, tm)
    Mp = grid_m * tm
    grid_n = _cdiv(_round_up(N, 128), tn)
    Np = grid_n * tn
    if mode == "ktiled":
        grid_k = _cdiv(K, tk)
        Kp = grid_k * tk
    else:
        grid_k = 1
        Kp = K

    # Zero-pad to tile multiples: lane-dense (128-multiple) output stores for
    # any n_runs, ragged n_peptides / n_factors handled; sliced back below.
    if (Mp, Kp) != (M, K):
        lhs = jnp.pad(lhs, ((0, Mp - M), (0, Kp - K)))
    if (Kp, Np) != (K, N):
        rhs = jnp.pad(rhs, ((0, Kp - K), (0, Np - N)))

    def build(use_hints):
        def spec(shape, index_map, buffers=None):
            if use_hints and buffers is not None:
                try:
                    return pl.BlockSpec(shape, index_map,
                                        pipeline_mode=pl.Buffered(buffers))
                except TypeError:
                    pass
            return pl.BlockSpec(shape, index_map)

        scratch = []
        if mode == "fullk_fulln":
            # run_factors fully resident (pinned, single buffer); 1-D grid
            # streams peptide-row blocks with deeper prefetch on LHS/OUT.
            grid = (grid_m,)
            in_specs = [spec((tm, Kp), lambda i: (i, 0), buffers=3),
                        spec((Kp, Np), lambda i: (0, 0), buffers=1)]
            out_specs = spec((tm, Np), lambda i: (i, 0), buffers=3)
            semantics = ("parallel",)
            kernel = _mf_kernel_fullk
        elif mode == "fullk":
            grid = (grid_m, grid_n)
            in_specs = [pl.BlockSpec((tm, Kp), lambda i, j: (i, 0)),
                        pl.BlockSpec((Kp, tn), lambda i, j: (0, j))]
            out_specs = pl.BlockSpec((tm, tn), lambda i, j: (i, j))
            semantics = ("parallel", "parallel")
            kernel = _mf_kernel_fullk
        else:
            grid = (grid_m, grid_n, grid_k)
            in_specs = [pl.BlockSpec((tm, tk), lambda i, j, k: (i, k)),
                        pl.BlockSpec((tk, tn), lambda i, j, k: (k, j))]
            out_specs = pl.BlockSpec((tm, tn), lambda i, j, k: (i, j))
            semantics = ("parallel", "parallel", "arbitrary")
            kernel = _mf_kernel_ktiled
            scratch = [pltpu.VMEM((tm, tn), jnp.float32)]

        return pl.pallas_call(
            kernel,
            out_shape=jax.ShapeDtypeStruct((Mp, Np), out_dtype),
            grid_spec=pltpu.PrefetchScalarGridSpec(
                num_scalar_prefetch=0,
                grid=grid,
                in_specs=in_specs,
                out_specs=out_specs,
                scratch_shapes=scratch),
            compiler_params=pltpu.CompilerParams(
                dimension_semantics=semantics,
                vmem_limit_bytes=vmem_limit),
        )

    try:
        out = build(True)(lhs, rhs)
    except Exception:
        # Older/stricter Pallas without pipeline_mode buffering hints.
        out = build(False)(lhs, rhs)

    if (Mp, Np) != (M, N):
        out = out[:M, :N]
    return out


# TODO(synk): parameter initialization (torch.manual_seed + torch.randn) is
# host-side setup in the PyTorch module; here it is replaced by jax.random.

if __name__ == "__main__":
    key = jax.random.PRNGKey(0)
    k1, k2, k3, k4, k5, k6 = jax.random.split(key, 6)

    # --- Primary path: module-sized problem (full-K, resident full-N RHS) ---
    n_peptides, n_runs, n_factors = 128, 256, 32
    peptide_factors = jax.random.normal(k1, (n_peptides, n_factors), jnp.float32)
    run_factors = jax.random.normal(k2, (n_factors, n_runs), jnp.float32)

    out = jax.block_until_ready(
        matrix_factorization_forward(peptide_factors, run_factors))
    ref = jnp.dot(peptide_factors, run_factors,
                  precision=jax.lax.Precision.HIGHEST)
    assert out.shape == (n_peptides, n_runs)
    assert jnp.allclose(out, ref, atol=1e-2, rtol=1e-2)

    # --- Ragged shapes: exercises M/N/K padding + lane-dense padded output --
    pep_r = jax.random.normal(k3, (61, 40), jnp.float32)
    run_r = jax.random.normal(k4, (40, 200), jnp.float32)
    out_r = jax.block_until_ready(matrix_factorization_forward(pep_r, run_r))
    ref_r = jnp.dot(pep_r, run_r, precision=jax.lax.Precision.HIGHEST)
    assert out_r.shape == (61, 200)
    assert jnp.allclose(out_r, ref_r, atol=1e-2, rtol=1e-2)

    # --- K-tiled fallback: forced with a tiny VMEM tile budget ---------------
    pep_k = jax.random.normal(k5, (64, 256), jnp.float32)
    run_k = jax.random.normal(k6, (256, 256), jnp.float32)
    out_k = jax.block_until_ready(
        matrix_factorization_forward(pep_k, run_k, vmem_tile_budget=192 * 1024))
    ref_k = jnp.dot(pep_k, run_k, precision=jax.lax.Precision.HIGHEST)
    assert jnp.allclose(out_k, ref_k, atol=1e-2, rtol=1e-2)

    # --- Optional bf16 factors (halved HBM traffic, f32 accumulate) ----------
    out_bf = jax.block_until_ready(
        matrix_factorization_forward(peptide_factors, run_factors,
                                     factor_dtype=jnp.bfloat16))
    ref_bf = jnp.dot(peptide_factors.astype(jnp.bfloat16).astype(jnp.float32),
                     run_factors.astype(jnp.bfloat16).astype(jnp.float32),
                     precision=jax.lax.Precision.HIGHEST)
    assert out_bf.dtype == jnp.float32
    assert jnp.allclose(out_bf, ref_bf, atol=5e-2, rtol=5e-2)

    print("KERNEL_OK")
</pallas_src>

<mosaic_0001>
module attributes {stable_mosaic.version = 11 : i64} {
  func.func @_mf_kernel_fullk(%arg0: i32, %arg1: memref<128x32xf32, #tpu.memory_space<vmem>>, %arg2: memref<32x256xf32, #tpu.memory_space<vmem>>, %arg3: memref<128x256xf32, #tpu.memory_space<vmem>>) attributes {dimension_semantics = [#tpu.dimension_semantics<parallel>], iteration_bounds = array<i64: 1>, scalar_prefetch = 0 : i64, scratch_operands = 0 : i64, tpu.core_type = #tpu.core_type<tc>, window_params = [{transform_indices = @transform_0, window_bounds = array<i64: 128, 32>}, {pipeline_mode = #tpu.pipeline_mode<synchronous>, transform_indices = @transform_1, window_bounds = array<i64: 32, 256>}, {transform_indices = @transform_2, window_bounds = array<i64: 128, 256>}]} {
    %c0 = arith.constant 0 : index
    %c0_0 = arith.constant 0 : index
    %0 = vector.load %arg1[%c0, %c0_0] : memref<128x32xf32, #tpu.memory_space<vmem>>, vector<128x32xf32>
    %c0_1 = arith.constant 0 : index
    %c0_2 = arith.constant 0 : index
    %1 = vector.load %arg2[%c0_1, %c0_2] : memref<32x256xf32, #tpu.memory_space<vmem>>, vector<32x256xf32>
    %cst = arith.constant dense<0.000000e+00> : vector<128x256xf32>
    %2 = tpu.matmul %0, %1, %cst {dimension_numbers = #tpu.dot_dimension_numbers<[1], [0], [0], [1], [0, 0, 1, 1], [], []>} : vector<128x32xf32>, vector<32x256xf32>, vector<128x256xf32> -> vector<128x256xf32>
    %c0_3 = arith.constant 0 : index
    %c0_4 = arith.constant 0 : index
    %3 = vector.load %arg3[%c0_3, %c0_4] : memref<128x256xf32, #tpu.memory_space<vmem>>, vector<128x256xf32>
    tpu.vector_store %arg3[%c0_3, %c0_4], %2 {strides = array<i32>} : memref<128x256xf32, #tpu.memory_space<vmem>>, vector<128x256xf32>,
    return
  }
  func.func @transform_0(%arg0: i32) -> (i32, i32) {
    %c0_i32 = arith.constant 0 : i32
    %c0_i32_0 = arith.constant 0 : i32
    return %arg0, %c0_i32 : i32, i32
  }
  func.func @transform_1(%arg0: i32) -> (i32, i32) {
    %c0_i32 = arith.constant 0 : i32
    %c0_i32_0 = arith.constant 0 : i32
    %c0_i32_1 = arith.constant 0 : i32
    return %c0_i32, %c0_i32_0 : i32, i32
  }
  func.func @transform_2(%arg0: i32) -> (i32, i32) {
    %c0_i32 = arith.constant 0 : i32
    %c0_i32_0 = arith.constant 0 : i32
    return %arg0, %c0_i32 : i32, i32
  }
}

</mosaic_0001>

<bundles_post_ra>
// kernel: tpu_custom_call.1
= control target key start
LH: loop header
LB: loop body
LE: loop exit
PB: predicated region body
PF: predicated region fallthrough
CT: control target
= control target key end

     0   :  { %vm36_vm0 = vcmask 261120   ;;  %s459_s0 = inlined_call_operand.vmem [shape: f32[128,32], index: 0, kind: input, shape index: {}]   ;;  %s460_s1 = inlined_call_operand.vmem [shape: f32[32,256], index: 1, kind: input, shape index: {}]   ;;  %s461_s2 = inlined_call_operand.hbm [shape: f32[128,256], index: 2, kind: output, shape index: {}]  }
   0x1   :  { %v34_v0 = vld [vmem:[%s460_s1 + $0x30] sm:$0xff]  ;;  %v35_v1 = vld [vmem:[%s460_s1 + $0x38] sm:$0xff]  ;;  %v32_v2 = vld [vmem:[%s460_s1 + $0x20] sm:$0xff] }
   0x2   :  { %297 = vmatpush.msra.mxu2 %v34_v0  ;;  %301 = vmatpush.msra.mxu3 %v35_v1  ;;  %v33_v3 = vld [vmem:[%s460_s1 + $0x28] sm:$0xff]  ;;  %v30_v4 = vld [vmem:[%s460_s1 + $0x10] sm:$0xff]  ;;  %v31_v5 = vld [vmem:[%s460_s1 + $0x18] sm:$0xff] }
   0x3   :  { %97 = vmatpush.msra.mxu0 %v34_v0  ;;  %162 = vmatpush.msra.mxu1 %v35_v1  ;;  %v28_v6 = vld [vmem:[%s460_s1] sm:$0xff]  ;;  %v29_v7 = vld [vmem:[%s460_s1 + $0x8] sm:$0xff] }
   0x4   :  { %298 = vmatpush.msra.mxu2 %v32_v2  ;;  %302 = vmatpush.msra.mxu3 %v33_v3  ;;  %v20_v8 = vld [vmem:[%s459_s0 + $0x40] sm:$0xff] }
   0x5   :  { %98 = vmatpush.msra.mxu0 %v32_v2  ;;  %163 = vmatpush.msra.mxu1 %v33_v3 }
   0x6   :  { %299 = vmatpush.msra.mxu2 %v30_v4  ;;  %303 = vmatpush.msra.mxu3 %v31_v5 }
   0x7   :  { %7 = vsyncpa [#allocation3], 0  ;;  %99 = vmatpush.msra.mxu0 %v30_v4  ;;  %164 = vmatpush.msra.mxu1 %v31_v5  ;;  %v12_v9 = vld [vmem:[%s459_s0] sm:$0xff]  ;;  %v21_v10 = vld [vmem:[%s459_s0 + $0x48] sm:$0xff]  ;;  %s253_s30 = sshll.u32 %s461_s2, 4  ;;  %s335_s3 = smov 256   ;;  %s254_s30 = int_to_ptr.hbm [resolvable:$true] %s253_s30 }
   0x8   :  { %300 = vmatpush.msra.mxu2 %v28_v6  ;;  %304 = vmatpush.msra.mxu3 %v29_v7  ;;  %v13_v11 = vld [vmem:[%s459_s0 + $0x8] sm:$0xff]  ;;  %v22_v12 = vld [vmem:[%s459_s0 + $0x50] sm:$0xff]  ;;  %v23_v14 = vld [vmem:[%s459_s0 + $0x58] sm:$0xff]  ;;  %s336_s4 = smov 16  }
   0x9   :  { %273 = vmatmul.msk.f32.vlgmr.msra.gmra.mxu2 %vm36_vm0, %v20_v8  ;;  %289 = vmatmul.msk.f32.vlgmr.msra.gmra.mxu3 %vm36_vm0, %v20_v8  ;;  %v14_v13 = vld [vmem:[%s459_s0 + $0x10] sm:$0xff]  ;;  %v15_v15 = vld [vmem:[%s459_s0 + $0x18] sm:$0xff]  ;;  %v24_v16 = vld [vmem:[%s459_s0 + $0x60] sm:$0xff] }
   0xa   :  { %100 = vmatpush.msra.mxu0 %v28_v6  ;;  %165 = vmatpush.msra.mxu1 %v29_v7  ;;  %v16_v17 = vld [vmem:[%s459_s0 + $0x20] sm:$0xff]  ;;  %v25_v18 = vld [vmem:[%s459_s0 + $0x68] sm:$0xff]  ;;  %v26_v20 = vld [vmem:[%s459_s0 + $0x70] sm:$0xff] }
   0xb   :  { %265 = vmatmul.msk.f32.vlgmr.msra.gmra.mxu0 %vm36_vm0, %v12_v9  ;;  %281 = vmatmul.msk.f32.vlgmr.msra.gmra.mxu1 %vm36_vm0, %v12_v9  ;;  %v17_v19 = vld [vmem:[%s459_s0 + $0x28] sm:$0xff]  ;;  %v18_v21 = vld [vmem:[%s459_s0 + $0x30] sm:$0xff]  ;;  %v27_v22 = vld [vmem:[%s459_s0 + $0x78] sm:$0xff] }
   0xc   :  { %v19_v23 = vld [vmem:[%s459_s0 + $0x38] sm:$0xff]  ;;  %s334_s0 = smov [#allocation2]  }
   0xd   :  { %s251_s28 = sshll.u32 %s334_s0, 4  ;;  %s252_s28 = int_to_ptr.vmem [resolvable:$true] %s251_s28 }
  0x11   :  { %274 = vmatmul.msk.f32.gmra.mxu2 %vm36_vm0, %v21_v10  ;;  %290 = vmatmul.msk.f32.gmra.mxu3 %vm36_vm0, %v21_v10 }
  0x13   :  { %266 = vmatmul.msk.f32.gmra.mxu0 %vm36_vm0, %v13_v11  ;;  %282 = vmatmul.msk.f32.gmra.mxu1 %vm36_vm0, %v13_v11 }
  0x19   :  { %275 = vmatmul.msk.f32.gmra.mxu2 %vm36_vm0, %v22_v12  ;;  %291 = vmatmul.msk.f32.gmra.mxu3 %vm36_vm0, %v22_v12 }
  0x1b   :  { %267 = vmatmul.msk.f32.gmra.mxu0 %vm36_vm0, %v14_v13  ;;  %283 = vmatmul.msk.f32.gmra.mxu1 %vm36_vm0, %v14_v13 }
  0x21   :  { %276 = vmatmul.msk.f32.gmra.mxu2 %vm36_vm0, %v23_v14  ;;  %292 = vmatmul.msk.f32.gmra.mxu3 %vm36_vm0, %v23_v14 }
  0x23   :  { %268 = vmatmul.msk.f32.gmra.mxu0 %vm36_vm0, %v15_v15  ;;  %284 = vmatmul.msk.f32.gmra.mxu1 %vm36_vm0, %v15_v15 }
  0x29   :  { %277 = vmatmul.msk.f32.gmra.mxu2 %vm36_vm0, %v24_v16  ;;  %293 = vmatmul.msk.f32.gmra.mxu3 %vm36_vm0, %v24_v16 }
  0x2b   :  { %269 = vmatmul.msk.f32.gmra.mxu0 %vm36_vm0, %v16_v17  ;;  %285 = vmatmul.msk.f32.gmra.mxu1 %vm36_vm0, %v16_v17 }
  0x31   :  { %278 = vmatmul.msk.f32.gmra.mxu2 %vm36_vm0, %v25_v18  ;;  %294 = vmatmul.msk.f32.gmra.mxu3 %vm36_vm0, %v25_v18 }
  0x33   :  { %270 = vmatmul.msk.f32.gmra.mxu0 %vm36_vm0, %v17_v19  ;;  %286 = vmatmul.msk.f32.gmra.mxu1 %vm36_vm0, %v17_v19 }
  0x39   :  { %279 = vmatmul.msk.f32.gmra.mxu2 %vm36_vm0, %v26_v20  ;;  %295 = vmatmul.msk.f32.gmra.mxu3 %vm36_vm0, %v26_v20 }
  0x3b   :  { %271 = vmatmul.msk.f32.gmra.mxu0 %vm36_vm0, %v18_v21  ;;  %287 = vmatmul.msk.f32.gmra.mxu1 %vm36_vm0, %v18_v21 }
  0x41   :  { %280 = vmatmul.msk.f32.gmra.mxu2 %vm36_vm0, %v27_v22  ;;  %296 = vmatmul.msk.f32.gmra.mxu3 %vm36_vm0, %v27_v22 }
  0x43   :  { %272 = vmatmul.msk.f32.gmra.mxu0 %vm36_vm0, %v19_v23  ;;  %288 = vmatmul.msk.f32.gmra.mxu1 %vm36_vm0, %v19_v23 }
  0x88   :  { %v102_v24 = vpop.f32.mrf.mxu0  ;;  %v167_v25 = vpop.f32.mrf.mxu1 }
  0x89   :  { %215 = vst [vmem:[#allocation2] sm:$0xff] %v102_v24 }
  0x8a   :  { %216 = vst [vmem:[#allocation2 + $0x8] sm:$0xff] %v167_v25 }
  0x8c   :  { %v126_v26 = vpop.f32.mrf.mxu2  ;;  %v191_v27 = vpop.f32.mrf.mxu3 }
  0x8d   :  { %231 = vst [vmem:[#allocation2 + $0x80] sm:$0xff] %v126_v26 }
  0x8e   :  { %232 = vst [vmem:[#allocation2 + $0x88] sm:$0xff] %v191_v27 }
  0x90   :  { %v105_v28 = vpop.f32.mrf.mxu0  ;;  %v170_v29 = vpop.f32.mrf.mxu1 }
  0x91   :  { %217 = vst [vmem:[#allocation2 + $0x10] sm:$0xff] %v105_v28 }
  0x92   :  { %218 = vst [vmem:[#allocation2 + $0x18] sm:$0xff] %v170_v29 }
  0x94   :  { %v129_v30 = vpop.f32.mrf.mxu2  ;;  %v194_v31 = vpop.f32.mrf.mxu3 }
  0x95   :  { %233 = vst [vmem:[#allocation2 + $0x90] sm:$0xff] %v129_v30 }
  0x96   :  { %234 = vst [vmem:[#allocation2 + $0x98] sm:$0xff] %v194_v31 }
  0x98   :  { %v108_v32 = vpop.f32.mrf.mxu0  ;;  %v173_v33 = vpop.f32.mrf.mxu1 }
  0x99   :  { %219 = vst [vmem:[#allocation2 + $0x20] sm:$0xff] %v108_v32 }
  0x9a   :  { %220 = vst [vmem:[#allocation2 + $0x28] sm:$0xff] %v173_v33 }
  0x9c   :  { %v132_v34 = vpop.f32.mrf.mxu2  ;;  %v197_v35 = vpop.f32.mrf.mxu3 }
  0x9d   :  { %235 = vst [vmem:[#allocation2 + $0xa0] sm:$0xff] %v132_v34 }
  0x9e   :  { %236 = vst [vmem:[#allocation2 + $0xa8] sm:$0xff] %v197_v35 }
  0xa0   :  { %v111_v36 = vpop.f32.mrf.mxu0  ;;  %v176_v37 = vpop.f32.mrf.mxu1 }
  0xa1   :  { %221 = vst [vmem:[#allocation2 + $0x30] sm:$0xff] %v111_v36 }
  0xa2   :  { %222 = vst [vmem:[#allocation2 + $0x38] sm:$0xff] %v176_v37 }
  0xa4   :  { %v135_v38 = vpop.f32.mrf.mxu2  ;;  %v200_v39 = vpop.f32.mrf.mxu3 }
  0xa5   :  { %237 = vst [vmem:[#allocation2 + $0xb0] sm:$0xff] %v135_v38 }
  0xa6   :  { %238 = vst [vmem:[#allocation2 + $0xb8] sm:$0xff] %v200_v39 }
  0xa8   :  { %v114_v40 = vpop.f32.mrf.mxu0  ;;  %v179_v41 = vpop.f32.mrf.mxu1 }
  0xa9   :  { %223 = vst [vmem:[#allocation2 + $0x40] sm:$0xff] %v114_v40 }
  0xaa   :  { %224 = vst [vmem:[#allocation2 + $0x48] sm:$0xff] %v179_v41 }
  0xac   :  { %v138_v42 = vpop.f32.mrf.mxu2  ;;  %v203_v43 = vpop.f32.mrf.mxu3 }
  0xad   :  { %239 = vst [vmem:[#allocation2 + $0xc0] sm:$0xff] %v138_v42 }
  0xae   :  { %240 = vst [vmem:[#allocation2 + $0xc8] sm:$0xff] %v203_v43 }
  0xb0   :  { %v117_v44 = vpop.f32.mrf.mxu0  ;;  %v182_v45 = vpop.f32.mrf.mxu1 }
  0xb1   :  { %225 = vst [vmem:[#allocation2 + $0x50] sm:$0xff] %v117_v44 }
  0xb2   :  { %226 = vst [vmem:[#allocation2 + $0x58] sm:$0xff] %v182_v45 }
  0xb4   :  { %v141_v46 = vpop.f32.mrf.mxu2  ;;  %v206_v47 = vpop.f32.mrf.mxu3 }
  0xb5   :  { %241 = vst [vmem:[#allocation2 + $0xd0] sm:$0xff] %v141_v46 }
  0xb6   :  { %242 = vst [vmem:[#allocation2 + $0xd8] sm:$0xff] %v206_v47 }
  0xb8   :  { %v120_v48 = vpop.f32.mrf.mxu0  ;;  %v185_v49 = vpop.f32.mrf.mxu1 }
  0xb9   :  { %227 = vst [vmem:[#allocation2 + $0x60] sm:$0xff] %v120_v48 }
  0xba   :  { %228 = vst [vmem:[#allocation2 + $0x68] sm:$0xff] %v185_v49 }
  0xbc   :  { %v144_v50 = vpop.f32.mrf.mxu2  ;;  %v209_v51 = vpop.f32.mrf.mxu3 }
  0xbd   :  { %243 = vst [vmem:[#allocation2 + $0xe0] sm:$0xff] %v144_v50 }
  0xbe   :  { %244 = vst [vmem:[#allocation2 + $0xe8] sm:$0xff] %v209_v51 }
  0xc0   :  { %v123_v52 = vpop.f32.mrf.mxu0  ;;  %v188_v53 = vpop.f32.mrf.mxu1 }
  0xc1   :  { %229 = vst [vmem:[#allocation2 + $0x70] sm:$0xff] %v123_v52 }
  0xc2   :  { %230 = vst [vmem:[#allocation2 + $0x78] sm:$0xff] %v188_v53 }
  0xc4   :  { %v147_v54 = vpop.f32.mrf.mxu2  ;;  %v212_v55 = vpop.f32.mrf.mxu3 }
  0xc5   :  { %245 = vst [vmem:[#allocation2 + $0xf0] sm:$0xff] %v147_v54 }
  0xc6   :  { %246 = vst [vmem:[#allocation2 + $0xf8] sm:$0xff] %v212_v55 }
  0xc7   :  { %259 = dma.vmem_to_hbm [thread:$0]  %s252_s28, 4096, %s254_s30, [#allocation3], %s335_s3, %s335_s3, %s336_s4  }
  0xc8   :  { %332 = dma.done.wait [#allocation3], 4096  }
  0xc9   :  { %333 = vsyncadd [#allocation3], 4294963200 }
  0xca   :  { %264 = vsyncpa [#allocation3], 1 }

</bundles_post_ra>
